<compile_context>
chip_gen: v6e
topology: v6e:2x2x1
jax: 0.10.0
libtpu: 0.0.40
codegen_flags: <defaults>
</compile_context>

<pallas_src>
import functools

import jax
import jax.numpy as jnp
from jax import lax
from jax.experimental import pallas as pl
from jax.experimental.pallas import tpu as pltpu

EPS = 1e-12


def _round_up(x, m):
    return ((x + m - 1) // m) * m


# -------------------------------------------------- spectral scale (plain JAX)
def _spectral_scale(weight, u, gamma, pow_iter, lip_const):
    """Power iteration -> sigma -> scale = gamma * lip_const / sigma.

    O(N*K) work (two matvecs per iteration); done in f32 plain JAX per the
    performance review so it never has to hold the full weight in VMEM.
    Also returns the updated `u` buffer (the PyTorch module's training-mode
    side effect)."""
    w = weight.astype(jnp.float32)
    uu = u.astype(jnp.float32)

    def l2n(t):
        return t / jnp.sqrt(jnp.sum(t * t) + EPS)

    def one_step(_, u_cur):
        v = l2n(u_cur @ w)
        return l2n(w @ v)

    if pow_iter > 1:  # static Python int
        uu = lax.fori_loop(0, pow_iter - 1, one_step, uu)

    v = l2n(uu @ w)
    wv = w @ v
    u_new = l2n(wv)
    sigma = u_new @ wv
    g = jnp.asarray(gamma, jnp.float32).reshape(())
    scale = g * (lip_const / sigma)
    return scale.reshape(1, 1), u_new


# ------------------------------------------------------------------ GEMM kernel
def _sn_matmul_kernel(scale_ref, x_ref, w_ref, b_ref, o_ref):
    """y_tile = (x_tile @ W_tile^T) * scale + bias.

    The output BlockSpec index map ignores k, so the f32 output tile stays
    resident in VMEM across the K reduction: init at k==0, accumulate in
    place, scale + bias epilogue at k==last (no separate accumulator scratch)."""
    k = pl.program_id(2)

    @pl.when(k == 0)
    def _():
        o_ref[...] = jnp.zeros_like(o_ref)

    # Contract the shared `in` axis directly (trans-B): no materialized W.T,
    # the MXU is fed straight from the (out, in) weight layout.
    o_ref[...] += lax.dot_general(
        x_ref[...], w_ref[...],
        dimension_numbers=(((1,), (1,)), ((), ())),
        preferred_element_type=jnp.float32)

    @pl.when(k == pl.num_programs(2) - 1)
    def _():
        o_ref[...] = o_ref[...] * scale_ref[0, 0] + b_ref[...]


# ----------------------------------------------------------------------- wrapper
def sn_linear_forward(x, weight, u, bias, gamma, *, pow_iter=1, lip_const=1.0,
                      tm=512, tn=512, tk=2048, return_u=False):
    """x: (B, in), weight: (out, in), u: (out,), bias: (out,) or None,
    gamma: scalar or None."""
    B, in_f = x.shape
    out_f, _ = weight.shape

    if bias is None:
        bias = jnp.zeros((out_f,), jnp.float32)
    if gamma is None:
        gamma = 1.0

    # ---- scale = gamma * lip_const / sigma (tiny, f32, plain JAX) ----------
    scale, u_new = _spectral_scale(weight, u, gamma, int(pow_iter), float(lip_const))

    bf16 = jnp.bfloat16
    f32 = jnp.float32

    # Tile sizes: clamp to (padded) problem size; bf16 packs 16 rows/vreg so
    # sublane-round M to 16; keep N/K lane-dense (multiples of 128).
    tm = min(tm, _round_up(B, 16))
    tn = min(tn, _round_up(out_f, 128))
    tk = min(tk, _round_up(in_f, 128))
    # Keep both v7x TensorCores busy: make sure the parallel (M x N) grid has
    # at least 2 blocks when the problem is big enough to split.
    if (_round_up(B, tm) // tm) * (_round_up(out_f, tn) // tn) < 2 and tn % 256 == 0:
        tn //= 2

    Bp = _round_up(B, tm)
    Np = _round_up(out_f, tn)
    Kp = _round_up(in_f, tk)

    # Pad + cast directly to bf16: single copy per operand, no f32 padded
    # intermediates (zero padding keeps the math exact; padded rows/cols are
    # sliced away at the end).
    x_b = jnp.pad(x.astype(bf16), ((0, Bp - B), (0, Kp - in_f)))
    w_b = jnp.pad(weight.astype(bf16), ((0, Np - out_f), (0, Kp - in_f)))
    b_p = jnp.pad(bias.astype(f32), (0, Np - out_f)).reshape(1, Np)

    grid = (Bp // tm, Np // tn, Kp // tk)
    m_blocks, n_blocks, _ = grid

    # VMEM budget: double-buffered bf16 x/W tiles + f32 bias tile + resident
    # f32 output tile (double-buffered).  Cap at 48 MiB: safe on v7x (64 MiB
    # physical), generous on v5e/v6e (128 MiB).
    vmem_need = 2 * (tm * tk * 2 + tn * tk * 2 + tn * 4) + 2 * tm * tn * 4
    vmem_limit = int(min(max(2 * vmem_need, 16 << 20), 48 << 20))

    # Accurate advisory traffic: W is re-streamed once per M block, x once per
    # N block.
    cost = pl.CostEstimate(
        flops=2 * Bp * Np * Kp,
        transcendentals=0,
        bytes_accessed=int(x_b.size * 2 * n_blocks
                           + w_b.size * 2 * m_blocks
                           + b_p.size * 4 * m_blocks
                           + Bp * Np * 4),
    )

    y_p = pl.pallas_call(
        _sn_matmul_kernel,
        out_shape=jax.ShapeDtypeStruct((Bp, Np), f32),
        grid_spec=pltpu.PrefetchScalarGridSpec(
            num_scalar_prefetch=0,
            grid=grid,
            in_specs=[
                pl.BlockSpec((1, 1), lambda i, j, k: (0, 0),
                             memory_space=pltpu.SMEM),          # scale scalar
                pl.BlockSpec((tm, tk), lambda i, j, k: (i, k)),  # x    (bf16)
                pl.BlockSpec((tn, tk), lambda i, j, k: (j, k)),  # W    (bf16)
                pl.BlockSpec((1, tn), lambda i, j, k: (0, j)),   # bias (f32)
            ],
            out_specs=pl.BlockSpec((tm, tn), lambda i, j, k: (i, j)),
        ),
        compiler_params=pltpu.CompilerParams(
            dimension_semantics=("parallel", "parallel", "arbitrary"),
            vmem_limit_bytes=vmem_limit,
        ),
        cost_estimate=cost,
    )(scale, x_b, w_b, b_p)

    y = y_p[:B, :out_f]
    # TODO(synk): the training-mode in-place update of the `u` buffer is a
    # module side effect; it is returned here (return_u=True) rather than
    # mutated in place.
    if return_u:
        return y, u_new
    return y


# --------------------------------------------------------------------- reference
def sn_linear_reference(x, weight, u, bias, gamma, *, pow_iter=1, lip_const=1.0):
    """Pure-JAX (f32) reference matching the PyTorch forward."""
    def l2n(t):
        return t / jnp.sqrt(jnp.sum(t * t) + EPS)

    uu = u
    for _ in range(pow_iter - 1):
        v = l2n(uu @ weight)
        uu = l2n(weight @ v)
    v = l2n(uu @ weight)
    wv = weight @ v
    u_new = l2n(wv)
    sigma = u_new @ wv
    w_bar = gamma * (lip_const * weight / sigma)
    return x @ w_bar.T + bias


if __name__ == "__main__":
    # Module config (small, consistent with SNLinear.__init__).
    in_features, out_features = 32, 16
    batch = 8
    pow_iter, lip_const = 1, 1.0

    key = jax.random.PRNGKey(0)
    k_x, k_w, k_u = jax.random.split(key, 3)

    # kaiming_normal_(a=0, mode='fan_in') -> N(0, sqrt(2 / fan_in))
    w_std = (2.0 / in_features) ** 0.5
    weight = jax.random.normal(k_w, (out_features, in_features), jnp.float32) * w_std
    u = jax.random.normal(k_u, (out_features,), jnp.float32)   # buffer 'u'
    bias = jnp.zeros((out_features,), jnp.float32)
    gamma = jnp.ones((), jnp.float32)                          # gamma init = 1

    x = jax.random.normal(k_x, (batch, in_features), jnp.float32)

    y = sn_linear_forward(x, weight, u, bias, gamma,
                          pow_iter=pow_iter, lip_const=lip_const)
    y = jax.block_until_ready(y)

    y_ref = sn_linear_reference(x, weight, u, bias, gamma,
                                pow_iter=pow_iter, lip_const=lip_const)

    assert y.shape == (batch, out_features)
    max_err = jnp.max(jnp.abs(y - y_ref))
    # GEMM runs in bf16 with f32 accumulation -> allow bf16-level tolerance.
    assert jnp.allclose(y, y_ref, atol=3e-2, rtol=3e-2), f"max abs err {max_err}"

    print("KERNEL_OK")
</pallas_src>

<mosaic_0001>
module attributes {stable_mosaic.version = 11 : i64} {
  func.func @_sn_matmul_kernel(%arg0: i32, %arg1: i32, %arg2: i32, %arg3: memref<1x1xf32, #tpu.memory_space<smem>>, %arg4: memref<16x128xbf16, #tpu.memory_space<vmem>>, %arg5: memref<128x128xbf16, #tpu.memory_space<vmem>>, %arg6: memref<1x128xf32, #tpu.memory_space<vmem>>, %arg7: memref<16x128xf32, #tpu.memory_space<vmem>>) attributes {dimension_semantics = [#tpu.dimension_semantics<parallel>, #tpu.dimension_semantics<parallel>, #tpu.dimension_semantics<arbitrary>], iteration_bounds = array<i64: 1, 1, 1>, scalar_prefetch = 0 : i64, scratch_operands = 0 : i64, tpu.core_type = #tpu.core_type<tc>, window_params = [{transform_indices = @transform_0, window_bounds = array<i64: 1, 1>}, {transform_indices = @transform_1, window_bounds = array<i64: 16, 128>}, {transform_indices = @transform_2, window_bounds = array<i64: 128, 128>}, {transform_indices = @transform_3, window_bounds = array<i64: 1, 128>}, {transform_indices = @transform_4, window_bounds = array<i64: 16, 128>}]} {
    %c0_i32 = arith.constant 0 : i32
    %0 = arith.cmpi eq, %arg2, %c0_i32 : i32
    %1 = arith.extui %0 : i1 to i32
    %c0_i32_0 = arith.constant 0 : i32
    %2 = arith.cmpi ne, %1, %c0_i32_0 : i32
    scf.if %2 {
      %cst_10 = arith.constant 0.000000e+00 : f32
      %12 = vector.broadcast %cst_10 : f32 to vector<16x128xf32>
      %c0_11 = arith.constant 0 : index
      %c0_12 = arith.constant 0 : index
      %13 = vector.load %arg7[%c0_11, %c0_12] : memref<16x128xf32, #tpu.memory_space<vmem>>, vector<16x128xf32>
      tpu.vector_store %arg7[%c0_11, %c0_12], %12 {strides = array<i32>} : memref<16x128xf32, #tpu.memory_space<vmem>>, vector<16x128xf32>,
    } else {
    }
    %c0 = arith.constant 0 : index
    %c0_1 = arith.constant 0 : index
    %3 = vector.load %arg7[%c0, %c0_1] : memref<16x128xf32, #tpu.memory_space<vmem>>, vector<16x128xf32>
    %c0_2 = arith.constant 0 : index
    %c0_3 = arith.constant 0 : index
    %4 = vector.load %arg4[%c0_2, %c0_3] : memref<16x128xbf16, #tpu.memory_space<vmem>>, vector<16x128xbf16>
    %c0_4 = arith.constant 0 : index
    %c0_5 = arith.constant 0 : index
    %5 = vector.load %arg5[%c0_4, %c0_5] : memref<128x128xbf16, #tpu.memory_space<vmem>>, vector<128x128xbf16>
    %cst = arith.constant dense<0.000000e+00> : vector<16x128xf32>
    %6 = tpu.matmul %4, %5, %cst {dimension_numbers = #tpu.dot_dimension_numbers<[1], [1], [0], [0], [0, 0, 1, 0], [], []>} : vector<16x128xbf16>, vector<128x128xbf16>, vector<16x128xf32> -> vector<16x128xf32>
    %7 = arith.addf %3, %6 : vector<16x128xf32>
    %c0_6 = arith.constant 0 : index
    %c0_7 = arith.constant 0 : index
    %8 = vector.load %arg7[%c0_6, %c0_7] : memref<16x128xf32, #tpu.memory_space<vmem>>, vector<16x128xf32>
    tpu.vector_store %arg7[%c0_6, %c0_7], %7 {strides = array<i32>} : memref<16x128xf32, #tpu.memory_space<vmem>>, vector<16x128xf32>,
    %c0_i32_8 = arith.constant 0 : i32
    %9 = arith.cmpi eq, %arg2, %c0_i32_8 : i32
    %10 = arith.extui %9 : i1 to i32
    %c0_i32_9 = arith.constant 0 : i32
    %11 = arith.cmpi ne, %10, %c0_i32_9 : i32
    scf.if %11 {
      %c0_10 = arith.constant 0 : index
      %c0_11 = arith.constant 0 : index
      %12 = vector.load %arg7[%c0_10, %c0_11] : memref<16x128xf32, #tpu.memory_space<vmem>>, vector<16x128xf32>
      %c0_12 = arith.constant 0 : index
      %c0_13 = arith.constant 0 : index
      %13 = memref.load %arg3[%c0_12, %c0_13] : memref<1x1xf32, #tpu.memory_space<smem>>
      %14 = vector.broadcast %13 : f32 to vector<16x128xf32>
      %15 = arith.mulf %12, %14 : vector<16x128xf32>
      %c0_14 = arith.constant 0 : index
      %c0_15 = arith.constant 0 : index
      %16 = vector.load %arg6[%c0_14, %c0_15] : memref<1x128xf32, #tpu.memory_space<vmem>>, vector<1x128xf32>
      %17 = vector.broadcast %16 : vector<1x128xf32> to vector<16x128xf32>
      %18 = arith.addf %15, %17 : vector<16x128xf32>
      %c0_16 = arith.constant 0 : index
      %c0_17 = arith.constant 0 : index
      %19 = vector.load %arg7[%c0_16, %c0_17] : memref<16x128xf32, #tpu.memory_space<vmem>>, vector<16x128xf32>
      tpu.vector_store %arg7[%c0_16, %c0_17], %18 {strides = array<i32>} : memref<16x128xf32, #tpu.memory_space<vmem>>, vector<16x128xf32>,
    } else {
    }
    return
  }
  func.func @transform_0(%arg0: i32, %arg1: i32, %arg2: i32) -> (i32, i32) {
    %c0_i32 = arith.constant 0 : i32
    %c0_i32_0 = arith.constant 0 : i32
    %c0_i32_1 = arith.constant 0 : i32
    return %c0_i32, %c0_i32_0 : i32, i32
  }
  func.func @transform_1(%arg0: i32, %arg1: i32, %arg2: i32) -> (i32, i32) {
    %c0_i32 = arith.constant 0 : i32
    return %arg0, %arg2 : i32, i32
  }
  func.func @transform_2(%arg0: i32, %arg1: i32, %arg2: i32) -> (i32, i32) {
    %c0_i32 = arith.constant 0 : i32
    return %arg1, %arg2 : i32, i32
  }
  func.func @transform_3(%arg0: i32, %arg1: i32, %arg2: i32) -> (i32, i32) {
    %c0_i32 = arith.constant 0 : i32
    %c0_i32_0 = arith.constant 0 : i32
    return %c0_i32, %arg1 : i32, i32
  }
  func.func @transform_4(%arg0: i32, %arg1: i32, %arg2: i32) -> (i32, i32) {
    %c0_i32 = arith.constant 0 : i32
    return %arg0, %arg1 : i32, i32
  }
}

</mosaic_0001>

<bundles_post_ra>
// kernel: tpu_custom_call.1
= control target key start
LH: loop header
LB: loop body
LE: loop exit
PB: predicated region body
PF: predicated region fallthrough
CT: control target
= control target key end

     0   :  { %10 = vsyncpa [#allocation4], 0  ;;  %s383_s0 = inlined_call_operand.<no memory space> [shape: f32[1,1], index: 0, kind: input, shape index: {}]   ;;  %s384_s1 = inlined_call_operand.hbm [shape: bf16[16,128], index: 1, kind: input, shape index: {}]   ;;  %s385_s2 = inlined_call_operand.hbm [shape: bf16[128,128], index: 2, kind: input, shape index: {}]   ;;  %s386_s3 = inlined_call_operand.vmem [shape: f32[1,128], index: 3, kind: input, shape index: {}]   ;;  %s387_s4 = inlined_call_operand.hbm [shape: f32[16,128], index: 4, kind: output, shape index: {}]  }
   0x1   :  { %11 = vsyncpa [#allocation7], 0 }
   0x2   :  { %12 = vsyncpa [#allocation5], 0  ;;  %s334_s15 = smov [#allocation3]  }
   0x3   :  { %s20_s16 = sshll.u32 %s334_s15, 4  ;;  %s21_s16 = int_to_ptr.vmem [resolvable:$true] %s20_s16 }
   0x4   :  { %s276_s17 = scalar_lea.vmem %s21_s16, 128  ;;  %p281_p1 = scmp.lt.s32.totalorder %s21_s16, %s21_s16 }
   0x5   :  { %p277_p0 = scmp.ne.s32.totalorder %s21_s16, %s276_s17  ;;  %p282_p2 = scmp.lt.s32.totalorder %s276_s17, %s276_s17 }
   0x7   :  { %p283_p3 = por %p282_p2, %p281_p1 }
   0x9   :  { %p284_p4 = pnand %p283_p3, %p277_p0 }
   0xb   :  { %287 = shalt.err (!%p284_p4)
}
   0xc   :  { %s335_s18 = smov 64   ;;  %s336_s19 = smov 4  }
   0xd   :  { %26 = dma.hbm_to_vmem [thread:$0]  %s384_s1, 128, %s21_s16, [#allocation4], %s335_s18, %s335_s18, %s336_s19  }
   0xe   :  { %s337_s22 = smov [#allocation6]  }
   0xf   :  { %s32_s23 = sshll.u32 %s337_s22, 4  ;;  %s33_s23 = int_to_ptr.vmem [resolvable:$true] %s32_s23 }
  0x10   :  { %s296_s24 = scalar_lea.vmem %s33_s23, 1024  ;;  %p301_p6 = scmp.lt.s32.totalorder %s33_s23, %s33_s23 }
  0x11   :  { %p297_p5 = scmp.ne.s32.totalorder %s33_s23, %s296_s24  ;;  %p302_p7 = scmp.lt.s32.totalorder %s296_s24, %s296_s24 }
  0x13   :  { %p303_p8 = por %p302_p7, %p301_p6 }
  0x15   :  { %p304_p9 = pnand %p303_p8, %p297_p5 }
  0x17   :  { %307 = shalt.err (!%p304_p9)
}
  0x18   :  { %38 = dma.hbm_to_vmem [thread:$0]  %s385_s2, 1024, %s33_s23, [#allocation7], %s335_s18, %s335_s18, %s336_s19  }
  0x19   :  { %328 = dma.done.wait [#allocation4], 128  }
  0x1a   :  { %329 = vsyncadd [#allocation4], 4294967168 }
  0x1b   :  { %330 = dma.done.wait [#allocation7], 1024  }
  0x1c   :  { %331 = vsyncadd [#allocation7], 4294966272  ;;  %v338_v0 = vmov 0.0   ;;  %vm339_vm0 = vmmov 0   ;;  %v259_v1 = vld [vmem:[#allocation6 + $0x38] sm:$0xff]   ;;  %v260_v2 = vld [vmem:[#allocation6 + $0x30] sm:$0xff]   ;;  %v179_v11 = vstv %s383_s0 }
  0x1d   :  { %230 = vmatprep.subr.bf16.mxu0 %v338_v0  ;;  %246 = vmatprep.mubr.msk.bf16.mxu0 %vm339_vm0, %v338_v0  ;;  %v261_v3 = vld [vmem:[#allocation6 + $0x28] sm:$0xff]   ;;  %v262_v4 = vld [vmem:[#allocation6 + $0x20] sm:$0xff]   ;;  %v263_v5 = vld [vmem:[#allocation6 + $0x18] sm:$0xff]   ;;  %s340_s29 = smov [#allocation8]  }
  0x1e   :  { %231 = vmatpush3.bf16.xpose.msra.mxu0 %v259_v1  ;;  %v264_v6 = vld [vmem:[#allocation6 + $0x10] sm:$0xff]   ;;  %v265_v7 = vld [vmem:[#allocation6 + $0x8] sm:$0xff]   ;;  %v266_v8 = vld [vmem:[#allocation6] sm:$0xff]   ;;  %s198_s30 = sshll.u32 %s340_s29, 4  ;;  %s199_s30 = int_to_ptr.vmem [resolvable:$true] %s198_s30 }
  0x1f   :  { %232 = vmatprep.subr.bf16.mxu0 %v338_v0  ;;  %v267_v9 = vld [vmem:[#allocation3] sm:$0xff]   ;;  %s308_s5 = scalar_lea.vmem %s199_s30, 256  ;;  %p313_p11 = scmp.lt.s32.totalorder %s199_s30, %s199_s30 }
  0x20   :  { %v220_v13 = vld [vmem:[%s386_s3] ss:$0 sm:$0xff]  ;;  %p309_p10 = scmp.ne.s32.totalorder %s199_s30, %s308_s5  ;;  %p314_p12 = scmp.lt.s32.totalorder %s308_s5, %s308_s5 }
  0x22   :  { %p315_p13 = por %p314_p12, %p313_p11 }
  0x24   :  { %p316_p0 = pnand %p315_p13, %p309_p10 }
  0x26   :  { %233 = vmatpush3.bf16.xpose.msra.mxu0 %v260_v2 }
  0x27   :  { %234 = vmatprep.subr.bf16.mxu0 %v338_v0 }
  0x2e   :  { %235 = vmatpush3.bf16.xpose.msra.mxu0 %v261_v3 }
  0x2f   :  { %236 = vmatprep.subr.bf16.mxu0 %v338_v0 }
  0x36   :  { %237 = vmatpush3.bf16.xpose.msra.mxu0 %v262_v4 }
  0x37   :  { %238 = vmatprep.subr.bf16.mxu0 %v338_v0 }
  0x3e   :  { %239 = vmatpush3.bf16.xpose.msra.mxu0 %v263_v5 }
  0x3f   :  { %240 = vmatprep.subr.bf16.mxu0 %v338_v0 }
  0x46   :  { %241 = vmatpush3.bf16.xpose.msra.mxu0 %v264_v6 }
  0x47   :  { %242 = vmatprep.subr.bf16.mxu0 %v338_v0 }
  0x4e   :  { %243 = vmatpush3.bf16.xpose.msra.mxu0 %v265_v7 }
  0x4f   :  { %244 = vmatprep.subr.bf16.mxu0 %v338_v0 }
  0x56   :  { %245 = vmatpush3.bf16.xpose.msra.mxu0 %v266_v8 }
  0x5d   :  { %247 = vmatmul.mubr.bf16.vlgmr.msra.gmra.mxu0 %v267_v9 }
 0x11d   :  { %v162_v10 = vpop.f32.mrf.mxu0 }
 0x11e   :  { %v180_v14 = vmul.f32 %v179_v11, %v162_v10 }
 0x11f   :  { %v248_v12 = vpop.f32.mrf.mxu0 }
 0x120   :  { %v189_v16 = vadd.f32 %v220_v13, %v180_v14 }
 0x121   :  { %v165_v15 = vpop.f32.mrf.mxu0 }
 0x122   :  { %v181_v18 = vmul.f32 %v179_v11, %v165_v15  ;;  %191 = vst [vmem:[#allocation8] sm:$0xff] %v189_v16 }
 0x123   :  { %v249_v17 = vpop.f32.mrf.mxu0 }
 0x124   :  { %v190_v19 = vadd.f32 %v220_v13, %v181_v18 }
 0x126   :  { %192 = vst [vmem:[#allocation8 + $0x8] sm:$0xff] %v190_v19 }
 0x127   :  { %319 = shalt.err (!%p316_p0)
}
 0x128   :  { %s341_s0 = smov 128   ;;  %s342_s3 = smov 8  }
 0x129   :  { %204 = dma.vmem_to_hbm [thread:$0]  %s199_s30, 256, %s387_s4, [#allocation5], %s341_s0, %s341_s0, %s342_s3  }
 0x12a   :  { %332 = dma.done.wait [#allocation5], 256  }
 0x12b   :  { %333 = vsyncadd [#allocation5], 4294967040 }
 0x12c   :  { %208 = vsyncpa [#allocation4], 1 }
 0x12d   :  { %209 = vsyncpa [#allocation7], 1 }
 0x12e   :  { %210 = vsyncpa [#allocation5], 1 }

</bundles_post_ra>
